<compile_context>
chip_gen: v7x
topology: tpu7x:2x2x1
jax: 0.10.0
libtpu: 0.0.40
codegen_flags: <defaults>
</compile_context>

<pallas_src>
import jax
import jax.numpy as jnp
from jax.experimental import pallas as pl
from jax.experimental.pallas import tpu as pltpu


# ----------------------------- kernel body ---------------------------------
def _fusion_kernel(x1_ref, x2_ref, x3_ref, w1_ref, bias_ref,
                   d2_ref, sx2_ref, d3_ref, sx3_ref, o_ref):
    f32, bf16 = jnp.float32, jnp.bfloat16
    h = o_ref.shape[1]                       # static output height

    # ---- x1 branch on the MXU: (H, C1*H) @ (C1*H, W) -> (H, W) ----
    acc = jnp.dot(w1_ref[...], x1_ref[0].astype(bf16),
                  preferred_element_type=f32)
    acc = acc + bias_ref[...]                # folded biases, (1,1) splat

    # ---- transposed-conv branches, 1x1-conv weights already folded in ----
    def branch(x_ref, d_ref, sx_ref, acc):
        xr = x_ref[0].astype(bf16)                                   # (C*Hin, Win)
        u = jnp.dot(d_ref[...], xr, preferred_element_type=f32)      # (4H, Win)
        u = u.astype(bf16)
        for k in range(4):                                           # x-taps, static unroll
            acc = acc + jnp.dot(u[k * h:(k + 1) * h, :], sx_ref[k],
                                preferred_element_type=f32)          # (H, W)
        return acc

    acc = branch(x2_ref, d2_ref, sx2_ref, acc)   # upsample_1 (k=4, s=2, p=1)
    acc = branch(x3_ref, d3_ref, sx3_ref, acc)   # upsample_2 (k=4, s=4, p=0)

    o_ref[0] = jnp.maximum(acc, 0.0).astype(o_ref.dtype)


# ------------------------ host-side matrix builders -------------------------
def _spread_fold(w_fold, h_out, h_in, stride, padding):
    """D[kx, oy, c*h_in + iy] = w_fold[c, oy - stride*iy + padding, kx] (0 if OOB)."""
    c_in, k, _ = w_fold.shape
    oy = jnp.arange(h_out)[:, None]
    iy = jnp.arange(h_in)[None, :]
    ky = oy - stride * iy + padding                              # (h_out, h_in)
    valid = (ky >= 0) & (ky < k)
    g = w_fold[:, jnp.clip(ky, 0, k - 1), :]                     # (c_in, h_out, h_in, k)
    g = jnp.where(valid[None, :, :, None], g, 0.0)
    return jnp.transpose(g, (3, 1, 0, 2)).reshape(k, h_out, c_in * h_in)


def _spread_x(k, w_out, w_in, stride, padding):
    """Sx[kx, ix, ox] = 1 iff ox == stride*ix - padding + kx (exact in bf16)."""
    ox = jnp.arange(w_out)[None, None, :]
    ix = jnp.arange(w_in)[None, :, None]
    kx = jnp.arange(k)[:, None, None]
    return (ox == stride * ix - padding + kx).astype(jnp.float32)


# ------------------------------- wrapper ------------------------------------
def fusion_forward(x1, x2, x3, params):
    """Pallas forward of the Fusion module.  Inputs NCHW, output (N, 1, H, W)."""
    n, c1, h, w = x1.shape
    _, c2, h2, w2 = x2.shape
    _, c3, h3, w3 = x3.shape
    assert x2.shape[0] == n and x3.shape[0] == n
    assert (2 * h2, 2 * w2) == (h, w), "upsample_1 must produce x1's spatial size"
    assert (4 * h3, 4 * w3) == (h, w), "upsample_2 must produce x1's spatial size"

    f32, bf16 = jnp.float32, jnp.bfloat16
    w_up1 = params["w_up1"].astype(f32)      # (C2, C2, 4, 4) torch ConvT (Cin, Cout, kH, kW)
    b_up1 = params["b_up1"].astype(f32)      # (C2,)
    w_up2 = params["w_up2"].astype(f32)      # (C3, C3, 4, 4)
    b_up2 = params["b_up2"].astype(f32)      # (C3,)
    w_fin = params["w_final"].astype(f32)    # (1, C1+C2+C3, 1, 1)
    b_fin = params["b_final"].astype(f32)    # (1,)

    wf = w_fin.reshape(-1)
    wf1, wf2, wf3 = wf[:c1], wf[c1:c1 + c2], wf[c1 + c2:]

    # Fold the 1x1-conv weights/biases through the (linear) transposed convs.
    w2_fold = jnp.einsum("iokl,o->ikl", w_up1, wf2)               # (C2, 4, 4)
    w3_fold = jnp.einsum("iokl,o->ikl", w_up2, wf3)               # (C3, 4, 4)
    bias = (b_fin[0] + jnp.dot(wf2, b_up1) + jnp.dot(wf3, b_up2)).reshape(1, 1)

    # bf16 MXU constants (host precomputed; sx are 0/1 so exact in bf16).
    d2 = _spread_fold(w2_fold, h, h2, 2, 1).reshape(4 * h, c2 * h2).astype(bf16)
    sx2 = _spread_x(4, w, w2, 2, 1).astype(bf16)                  # (4, W2, W)
    d3 = _spread_fold(w3_fold, h, h3, 4, 0).reshape(4 * h, c3 * h3).astype(bf16)
    sx3 = _spread_x(4, w, w3, 4, 0).astype(bf16)                  # (4, W3, W)

    # x1 1x1-conv as a block selection matrix: Wsel[oy, c*H + iy] = wf1[c]*delta(oy,iy)
    w1_sel = jnp.einsum("c,oi->oci", wf1, jnp.eye(h, dtype=f32)).reshape(h, c1 * h)
    w1_sel = w1_sel.astype(bf16)

    # Free, contiguous reshapes only -- no host-side dtype copies of activations.
    x1r = x1.reshape(n, c1 * h, w)
    x2r = x2.reshape(n, c2 * h2, w2)
    x3r = x3.reshape(n, c3 * h3, w3)

    out = pl.pallas_call(
        _fusion_kernel,
        out_shape=jax.ShapeDtypeStruct((n, h, w), f32),
        grid=(n,),
        in_specs=[
            pl.BlockSpec((1, c1 * h, w), lambda i: (i, 0, 0)),
            pl.BlockSpec((1, c2 * h2, w2), lambda i: (i, 0, 0)),
            pl.BlockSpec((1, c3 * h3, w3), lambda i: (i, 0, 0)),
            pl.BlockSpec((h, c1 * h), lambda i: (0, 0)),
            pl.BlockSpec((1, 1), lambda i: (0, 0)),
            pl.BlockSpec((4 * h, c2 * h2), lambda i: (0, 0)),
            pl.BlockSpec((4, w2, w), lambda i: (0, 0, 0)),
            pl.BlockSpec((4 * h, c3 * h3), lambda i: (0, 0)),
            pl.BlockSpec((4, w3, w), lambda i: (0, 0, 0)),
        ],
        out_specs=pl.BlockSpec((1, h, w), lambda i: (i, 0, 0)),
        compiler_params=pltpu.CompilerParams(
            dimension_semantics=("parallel",),       # batch steps shard across v7x TCs
            vmem_limit_bytes=48 * 1024 * 1024,       # fits v7x 64 MiB with headroom
        ),
    )(x1r, x2r, x3r, w1_sel, bias, d2, sx2, d3, sx3)

    return out[:, None, :, :]                                     # (N, 1, H, W)


class Fusion:
    """JAX/Pallas counterpart of the PyTorch Fusion nn.Module (forward only)."""

    def __init__(self, params):
        self.params = params

    def __call__(self, x1, x2, x3):
        return fusion_forward(x1, x2, x3, self.params)


# ------------------------- pure-JAX reference -------------------------------
def _conv_transpose_ref(x, w, b, stride, padding):
    # PyTorch ConvTranspose2d semantics; w: (Cin, Cout, K, K)
    k = w.shape[2]
    w_conv = jnp.flip(jnp.transpose(w, (1, 0, 2, 3)), axis=(2, 3))   # (Cout, Cin, K, K)
    pad = k - 1 - padding
    y = jax.lax.conv_general_dilated(
        x, w_conv, window_strides=(1, 1),
        padding=((pad, pad), (pad, pad)),
        lhs_dilation=(stride, stride),
        dimension_numbers=("NCHW", "OIHW", "NCHW"))
    return y + b[None, :, None, None]


def fusion_reference(x1, x2, x3, params):
    u2 = _conv_transpose_ref(x2, params["w_up1"], params["b_up1"], 2, 1)
    u3 = _conv_transpose_ref(x3, params["w_up2"], params["b_up2"], 4, 0)
    xc = jnp.concatenate([x1, u2, u3], axis=1)
    y = jax.lax.conv_general_dilated(
        xc, params["w_final"], window_strides=(1, 1), padding="VALID",
        dimension_numbers=("NCHW", "OIHW", "NCHW"))
    y = y + params["b_final"][None, :, None, None]
    return jnp.maximum(y, 0.0)


if __name__ == "__main__":
    key = jax.random.PRNGKey(0)
    n, c1, c2, c3 = 2, 4, 8, 16
    h = w = 16

    ks = jax.random.split(key, 9)
    x1 = jax.random.normal(ks[0], (n, c1, h, w), dtype=jnp.float32)
    x2 = jax.random.normal(ks[1], (n, c2, h // 2, w // 2), dtype=jnp.float32)
    x3 = jax.random.normal(ks[2], (n, c3, h // 4, w // 4), dtype=jnp.float32)

    params = {
        "w_up1": 0.1 * jax.random.normal(ks[3], (c2, c2, 4, 4), dtype=jnp.float32),
        "b_up1": 0.1 * jax.random.normal(ks[4], (c2,), dtype=jnp.float32),
        "w_up2": 0.1 * jax.random.normal(ks[5], (c3, c3, 4, 4), dtype=jnp.float32),
        "b_up2": 0.1 * jax.random.normal(ks[6], (c3,), dtype=jnp.float32),
        "w_final": 0.1 * jax.random.normal(ks[7], (1, c1 + c2 + c3, 1, 1), dtype=jnp.float32),
        "b_final": 0.1 * jax.random.normal(ks[8], (1,), dtype=jnp.float32),
    }

    mod = Fusion(params)
    out = jax.block_until_ready(mod(x1, x2, x3))
    ref = jax.block_until_ready(fusion_reference(x1, x2, x3, params))

    assert out.shape == ref.shape == (n, 1, h, w), (out.shape, ref.shape)
    # bf16 MXU operands (f32 accumulation) -> slightly looser tolerance vs f32 ref.
    max_err = float(jnp.max(jnp.abs(out - ref)))
    assert max_err < 5e-2, f"Pallas Fusion mismatch vs reference: max_err={max_err}"
    print("KERNEL_OK")
</pallas_src>

<mosaic_0001>
module attributes {stable_mosaic.version = 11 : i64} {
  func.func @_fusion_kernel(%arg0: i32, %arg1: memref<1x64x16xf32, #tpu.memory_space<vmem>>, %arg2: memref<1x64x8xf32, #tpu.memory_space<vmem>>, %arg3: memref<1x64x4xf32, #tpu.memory_space<vmem>>, %arg4: memref<16x64xbf16, #tpu.memory_space<vmem>>, %arg5: memref<1x1xf32, #tpu.memory_space<vmem>>, %arg6: memref<64x64xbf16, #tpu.memory_space<vmem>>, %arg7: memref<4x8x16xbf16, #tpu.memory_space<vmem>>, %arg8: memref<64x64xbf16, #tpu.memory_space<vmem>>, %arg9: memref<4x4x16xbf16, #tpu.memory_space<vmem>>, %arg10: memref<1x16x16xf32, #tpu.memory_space<vmem>>) attributes {dimension_semantics = [#tpu.dimension_semantics<parallel>], iteration_bounds = array<i64: 2>, scalar_prefetch = 0 : i64, scratch_operands = 0 : i64, tpu.core_type = #tpu.core_type<tc>, window_params = [{transform_indices = @transform_0, window_bounds = array<i64: 1, 64, 16>}, {transform_indices = @transform_1, window_bounds = array<i64: 1, 64, 8>}, {transform_indices = @transform_2, window_bounds = array<i64: 1, 64, 4>}, {pipeline_mode = #tpu.pipeline_mode<synchronous>, transform_indices = @transform_3, window_bounds = array<i64: 16, 64>}, {pipeline_mode = #tpu.pipeline_mode<synchronous>, transform_indices = @transform_4, window_bounds = array<i64: 1, 1>}, {pipeline_mode = #tpu.pipeline_mode<synchronous>, transform_indices = @transform_5, window_bounds = array<i64: 64, 64>}, {pipeline_mode = #tpu.pipeline_mode<synchronous>, transform_indices = @transform_6, window_bounds = array<i64: 4, 8, 16>}, {pipeline_mode = #tpu.pipeline_mode<synchronous>, transform_indices = @transform_7, window_bounds = array<i64: 64, 64>}, {pipeline_mode = #tpu.pipeline_mode<synchronous>, transform_indices = @transform_8, window_bounds = array<i64: 4, 4, 16>}, {transform_indices = @transform_9, window_bounds = array<i64: 1, 16, 16>}]} {
    %c0 = arith.constant 0 : index
    %c0_0 = arith.constant 0 : index
    %0 = vector.load %arg4[%c0, %c0_0] : memref<16x64xbf16, #tpu.memory_space<vmem>>, vector<16x64xbf16>
    %c0_1 = arith.constant 0 : index
    %c0_2 = arith.constant 0 : index
    %c0_3 = arith.constant 0 : index
    %1 = vector.load %arg1[%c0_1, %c0_2, %c0_3] : memref<1x64x16xf32, #tpu.memory_space<vmem>>, vector<1x64x16xf32>
    %2 = vector.shape_cast %1 : vector<1x64x16xf32> to vector<64x16xf32>
    %3 = arith.truncf %2 : vector<64x16xf32> to vector<64x16xbf16>
    %cst = arith.constant dense<0.000000e+00> : vector<16x16xf32>
    %4 = tpu.matmul %0, %3, %cst {dimension_numbers = #tpu.dot_dimension_numbers<[1], [0], [0], [1], [0, 0, 1, 1], [], []>} : vector<16x64xbf16>, vector<64x16xbf16>, vector<16x16xf32> -> vector<16x16xf32>
    %c0_4 = arith.constant 0 : index
    %c0_5 = arith.constant 0 : index
    %5 = vector.load %arg5[%c0_4, %c0_5] : memref<1x1xf32, #tpu.memory_space<vmem>>, vector<1x1xf32>
    %6 = vector.broadcast %5 : vector<1x1xf32> to vector<16x16xf32>
    %7 = arith.addf %4, %6 : vector<16x16xf32>
    %c0_6 = arith.constant 0 : index
    %c0_7 = arith.constant 0 : index
    %c0_8 = arith.constant 0 : index
    %8 = vector.load %arg2[%c0_6, %c0_7, %c0_8] : memref<1x64x8xf32, #tpu.memory_space<vmem>>, vector<1x64x8xf32>
    %9 = vector.shape_cast %8 : vector<1x64x8xf32> to vector<64x8xf32>
    %10 = arith.truncf %9 : vector<64x8xf32> to vector<64x8xbf16>
    %c0_9 = arith.constant 0 : index
    %c0_10 = arith.constant 0 : index
    %11 = vector.load %arg6[%c0_9, %c0_10] : memref<64x64xbf16, #tpu.memory_space<vmem>>, vector<64x64xbf16>
    %cst_11 = arith.constant dense<0.000000e+00> : vector<64x8xf32>
    %12 = tpu.matmul %11, %10, %cst_11 {dimension_numbers = #tpu.dot_dimension_numbers<[1], [0], [0], [1], [0, 0, 1, 1], [], []>} : vector<64x64xbf16>, vector<64x8xbf16>, vector<64x8xf32> -> vector<64x8xf32>
    %13 = arith.truncf %12 : vector<64x8xf32> to vector<64x8xbf16>
    %14 = vector.extract_strided_slice %13 {offsets = [0, 0], sizes = [16, 8], strides = [1, 1]} : vector<64x8xbf16> to vector<16x8xbf16>
    %c0_12 = arith.constant 0 : index
    %c0_13 = arith.constant 0 : index
    %c0_14 = arith.constant 0 : index
    %15 = vector.load %arg7[%c0_12, %c0_13, %c0_14] : memref<4x8x16xbf16, #tpu.memory_space<vmem>>, vector<1x8x16xbf16>
    %16 = vector.shape_cast %15 : vector<1x8x16xbf16> to vector<8x16xbf16>
    %cst_15 = arith.constant dense<0.000000e+00> : vector<16x16xf32>
    %17 = tpu.matmul %14, %16, %cst_15 {dimension_numbers = #tpu.dot_dimension_numbers<[1], [0], [0], [1], [0, 0, 1, 1], [], []>} : vector<16x8xbf16>, vector<8x16xbf16>, vector<16x16xf32> -> vector<16x16xf32>
    %18 = arith.addf %7, %17 : vector<16x16xf32>
    %19 = vector.extract_strided_slice %13 {offsets = [16, 0], sizes = [16, 8], strides = [1, 1]} : vector<64x8xbf16> to vector<16x8xbf16>
    %c1 = arith.constant 1 : index
    %c0_16 = arith.constant 0 : index
    %c0_17 = arith.constant 0 : index
    %20 = vector.load %arg7[%c1, %c0_16, %c0_17] : memref<4x8x16xbf16, #tpu.memory_space<vmem>>, vector<1x8x16xbf16>
    %21 = vector.shape_cast %20 : vector<1x8x16xbf16> to vector<8x16xbf16>
    %cst_18 = arith.constant dense<0.000000e+00> : vector<16x16xf32>
    %22 = tpu.matmul %19, %21, %cst_18 {dimension_numbers = #tpu.dot_dimension_numbers<[1], [0], [0], [1], [0, 0, 1, 1], [], []>} : vector<16x8xbf16>, vector<8x16xbf16>, vector<16x16xf32> -> vector<16x16xf32>
    %23 = arith.addf %18, %22 : vector<16x16xf32>
    %24 = vector.extract_strided_slice %13 {offsets = [32, 0], sizes = [16, 8], strides = [1, 1]} : vector<64x8xbf16> to vector<16x8xbf16>
    %c2 = arith.constant 2 : index
    %c0_19 = arith.constant 0 : index
    %c0_20 = arith.constant 0 : index
    %25 = vector.load %arg7[%c2, %c0_19, %c0_20] : memref<4x8x16xbf16, #tpu.memory_space<vmem>>, vector<1x8x16xbf16>
    %26 = vector.shape_cast %25 : vector<1x8x16xbf16> to vector<8x16xbf16>
    %cst_21 = arith.constant dense<0.000000e+00> : vector<16x16xf32>
    %27 = tpu.matmul %24, %26, %cst_21 {dimension_numbers = #tpu.dot_dimension_numbers<[1], [0], [0], [1], [0, 0, 1, 1], [], []>} : vector<16x8xbf16>, vector<8x16xbf16>, vector<16x16xf32> -> vector<16x16xf32>
    %28 = arith.addf %23, %27 : vector<16x16xf32>
    %29 = vector.extract_strided_slice %13 {offsets = [48, 0], sizes = [16, 8], strides = [1, 1]} : vector<64x8xbf16> to vector<16x8xbf16>
    %c3 = arith.constant 3 : index
    %c0_22 = arith.constant 0 : index
    %c0_23 = arith.constant 0 : index
    %30 = vector.load %arg7[%c3, %c0_22, %c0_23] : memref<4x8x16xbf16, #tpu.memory_space<vmem>>, vector<1x8x16xbf16>
    %31 = vector.shape_cast %30 : vector<1x8x16xbf16> to vector<8x16xbf16>
    %cst_24 = arith.constant dense<0.000000e+00> : vector<16x16xf32>
    %32 = tpu.matmul %29, %31, %cst_24 {dimension_numbers = #tpu.dot_dimension_numbers<[1], [0], [0], [1], [0, 0, 1, 1], [], []>} : vector<16x8xbf16>, vector<8x16xbf16>, vector<16x16xf32> -> vector<16x16xf32>
    %33 = arith.addf %28, %32 : vector<16x16xf32>
    %c0_25 = arith.constant 0 : index
    %c0_26 = arith.constant 0 : index
    %c0_27 = arith.constant 0 : index
    %34 = vector.load %arg3[%c0_25, %c0_26, %c0_27] : memref<1x64x4xf32, #tpu.memory_space<vmem>>, vector<1x64x4xf32>
    %35 = vector.shape_cast %34 : vector<1x64x4xf32> to vector<64x4xf32>
    %36 = arith.truncf %35 : vector<64x4xf32> to vector<64x4xbf16>
    %c0_28 = arith.constant 0 : index
    %c0_29 = arith.constant 0 : index
    %37 = vector.load %arg8[%c0_28, %c0_29] : memref<64x64xbf16, #tpu.memory_space<vmem>>, vector<64x64xbf16>
    %cst_30 = arith.constant dense<0.000000e+00> : vector<64x4xf32>
    %38 = tpu.matmul %37, %36, %cst_30 {dimension_numbers = #tpu.dot_dimension_numbers<[1], [0], [0], [1], [0, 0, 1, 1], [], []>} : vector<64x64xbf16>, vector<64x4xbf16>, vector<64x4xf32> -> vector<64x4xf32>
    %39 = arith.truncf %38 : vector<64x4xf32> to vector<64x4xbf16>
    %40 = vector.extract_strided_slice %39 {offsets = [0, 0], sizes = [16, 4], strides = [1, 1]} : vector<64x4xbf16> to vector<16x4xbf16>
    %c0_31 = arith.constant 0 : index
    %c0_32 = arith.constant 0 : index
    %c0_33 = arith.constant 0 : index
    %41 = vector.load %arg9[%c0_31, %c0_32, %c0_33] : memref<4x4x16xbf16, #tpu.memory_space<vmem>>, vector<1x4x16xbf16>
    %42 = vector.shape_cast %41 : vector<1x4x16xbf16> to vector<4x16xbf16>
    %cst_34 = arith.constant dense<0.000000e+00> : vector<16x16xf32>
    %43 = tpu.matmul %40, %42, %cst_34 {dimension_numbers = #tpu.dot_dimension_numbers<[1], [0], [0], [1], [0, 0, 1, 1], [], []>} : vector<16x4xbf16>, vector<4x16xbf16>, vector<16x16xf32> -> vector<16x16xf32>
    %44 = arith.addf %33, %43 : vector<16x16xf32>
    %45 = vector.extract_strided_slice %39 {offsets = [16, 0], sizes = [16, 4], strides = [1, 1]} : vector<64x4xbf16> to vector<16x4xbf16>
    %c1_35 = arith.constant 1 : index
    %c0_36 = arith.constant 0 : index
    %c0_37 = arith.constant 0 : index
    %46 = vector.load %arg9[%c1_35, %c0_36, %c0_37] : memref<4x4x16xbf16, #tpu.memory_space<vmem>>, vector<1x4x16xbf16>
    %47 = vector.shape_cast %46 : vector<1x4x16xbf16> to vector<4x16xbf16>
    %cst_38 = arith.constant dense<0.000000e+00> : vector<16x16xf32>
    %48 = tpu.matmul %45, %47, %cst_38 {dimension_numbers = #tpu.dot_dimension_numbers<[1], [0], [0], [1], [0, 0, 1, 1], [], []>} : vector<16x4xbf16>, vector<4x16xbf16>, vector<16x16xf32> -> vector<16x16xf32>
    %49 = arith.addf %44, %48 : vector<16x16xf32>
    %50 = vector.extract_strided_slice %39 {offsets = [32, 0], sizes = [16, 4], strides = [1, 1]} : vector<64x4xbf16> to vector<16x4xbf16>
    %c2_39 = arith.constant 2 : index
    %c0_40 = arith.constant 0 : index
    %c0_41 = arith.constant 0 : index
    %51 = vector.load %arg9[%c2_39, %c0_40, %c0_41] : memref<4x4x16xbf16, #tpu.memory_space<vmem>>, vector<1x4x16xbf16>
    %52 = vector.shape_cast %51 : vector<1x4x16xbf16> to vector<4x16xbf16>
    %cst_42 = arith.constant dense<0.000000e+00> : vector<16x16xf32>
    %53 = tpu.matmul %50, %52, %cst_42 {dimension_numbers = #tpu.dot_dimension_numbers<[1], [0], [0], [1], [0, 0, 1, 1], [], []>} : vector<16x4xbf16>, vector<4x16xbf16>, vector<16x16xf32> -> vector<16x16xf32>
    %54 = arith.addf %49, %53 : vector<16x16xf32>
    %55 = vector.extract_strided_slice %39 {offsets = [48, 0], sizes = [16, 4], strides = [1, 1]} : vector<64x4xbf16> to vector<16x4xbf16>
    %c3_43 = arith.constant 3 : index
    %c0_44 = arith.constant 0 : index
    %c0_45 = arith.constant 0 : index
    %56 = vector.load %arg9[%c3_43, %c0_44, %c0_45] : memref<4x4x16xbf16, #tpu.memory_space<vmem>>, vector<1x4x16xbf16>
    %57 = vector.shape_cast %56 : vector<1x4x16xbf16> to vector<4x16xbf16>
    %cst_46 = arith.constant dense<0.000000e+00> : vector<16x16xf32>
    %58 = tpu.matmul %55, %57, %cst_46 {dimension_numbers = #tpu.dot_dimension_numbers<[1], [0], [0], [1], [0, 0, 1, 1], [], []>} : vector<16x4xbf16>, vector<4x16xbf16>, vector<16x16xf32> -> vector<16x16xf32>
    %59 = arith.addf %54, %58 : vector<16x16xf32>
    %cst_47 = arith.constant 0.000000e+00 : f32
    %60 = vector.broadcast %cst_47 : f32 to vector<16x16xf32>
    %61 = arith.maximumf %59, %60 : vector<16x16xf32>
    %c0_48 = arith.constant 0 : index
    %c0_49 = arith.constant 0 : index
    %c0_50 = arith.constant 0 : index
    %62 = vector.load %arg10[%c0_48, %c0_49, %c0_50] : memref<1x16x16xf32, #tpu.memory_space<vmem>>, vector<1x16x16xf32>
    %63 = vector.shape_cast %62 : vector<1x16x16xf32> to vector<16x16xf32>
    %64 = vector.shape_cast %61 : vector<16x16xf32> to vector<1x16x16xf32>
    tpu.vector_store %arg10[%c0_48, %c0_49, %c0_50], %64 {strides = array<i32>} : memref<1x16x16xf32, #tpu.memory_space<vmem>>, vector<1x16x16xf32>,
    return
  }
  func.func @transform_0(%arg0: i32) -> (i32, i32, i32) {
    %c0_i32 = arith.constant 0 : i32
    %c0_i32_0 = arith.constant 0 : i32
    %c0_i32_1 = arith.constant 0 : i32
    return %arg0, %c0_i32, %c0_i32_0 : i32, i32, i32
  }
  func.func @transform_1(%arg0: i32) -> (i32, i32, i32) {
    %c0_i32 = arith.constant 0 : i32
    %c0_i32_0 = arith.constant 0 : i32
    %c0_i32_1 = arith.constant 0 : i32
    return %arg0, %c0_i32, %c0_i32_0 : i32, i32, i32
  }
  func.func @transform_2(%arg0: i32) -> (i32, i32, i32) {
    %c0_i32 = arith.constant 0 : i32
    %c0_i32_0 = arith.constant 0 : i32
    %c0_i32_1 = arith.constant 0 : i32
    return %arg0, %c0_i32, %c0_i32_0 : i32, i32, i32
  }
  func.func @transform_3(%arg0: i32) -> (i32, i32) {
    %c0_i32 = arith.constant 0 : i32
    %c0_i32_0 = arith.constant 0 : i32
    %c0_i32_1 = arith.constant 0 : i32
    return %c0_i32, %c0_i32_0 : i32, i32
  }
  func.func @transform_4(%arg0: i32) -> (i32, i32) {
    %c0_i32 = arith.constant 0 : i32
    %c0_i32_0 = arith.constant 0 : i32
    %c0_i32_1 = arith.constant 0 : i32
    return %c0_i32, %c0_i32_0 : i32, i32
  }
  func.func @transform_5(%arg0: i32) -> (i32, i32) {
    %c0_i32 = arith.constant 0 : i32
    %c0_i32_0 = arith.constant 0 : i32
    %c0_i32_1 = arith.constant 0 : i32
    return %c0_i32, %c0_i32_0 : i32, i32
  }
  func.func @transform_6(%arg0: i32) -> (i32, i32, i32) {
    %c0_i32 = arith.constant 0 : i32
    %c0_i32_0 = arith.constant 0 : i32
    %c0_i32_1 = arith.constant 0 : i32
    %c0_i32_2 = arith.constant 0 : i32
    return %c0_i32, %c0_i32_0, %c0_i32_1 : i32, i32, i32
  }
  func.func @transform_7(%arg0: i32) -> (i32, i32) {
    %c0_i32 = arith.constant 0 : i32
    %c0_i32_0 = arith.constant 0 : i32
    %c0_i32_1 = arith.constant 0 : i32
    return %c0_i32, %c0_i32_0 : i32, i32
  }
  func.func @transform_8(%arg0: i32) -> (i32, i32, i32) {
    %c0_i32 = arith.constant 0 : i32
    %c0_i32_0 = arith.constant 0 : i32
    %c0_i32_1 = arith.constant 0 : i32
    %c0_i32_2 = arith.constant 0 : i32
    return %c0_i32, %c0_i32_0, %c0_i32_1 : i32, i32, i32
  }
  func.func @transform_9(%arg0: i32) -> (i32, i32, i32) {
    %c0_i32 = arith.constant 0 : i32
    %c0_i32_0 = arith.constant 0 : i32
    %c0_i32_1 = arith.constant 0 : i32
    return %arg0, %c0_i32, %c0_i32_0 : i32, i32, i32
  }
}

</mosaic_0001>

<bundles_post_ra>
// kernel: tpu_custom_call.1
= control target key start
LH: loop header
LB: loop body
LE: loop exit
PB: predicated region body
PF: predicated region fallthrough
CT: control target
= control target key end

     0   :  { %s1822_s0 = inlined_call_operand.vmem [shape: f32[2,64,16], index: 0, kind: input, shape index: {}]   ;;  %s1823_s1 = inlined_call_operand.vmem [shape: f32[2,64,8], index: 1, kind: input, shape index: {}]   ;;  %s1824_s2 = inlined_call_operand.vmem [shape: f32[2,64,4], index: 2, kind: input, shape index: {}]   ;;  %s1825_s3 = inlined_call_operand.vmem [shape: bf16[16,64], index: 3, kind: input, shape index: {}]   ;;  %s1826_s4 = inlined_call_operand.<no memory space> [shape: f32[1,1], index: 4, kind: input, shape index: {}]   ;;  %s1827_s5 = inlined_call_operand.vmem [shape: bf16[64,64], index: 5, kind: input, shape index: {}]   ;;  %s1828_s6 = inlined_call_operand.vmem [shape: bf16[4,8,16], index: 6, kind: input, shape index: {}]   ;;  %s1829_s7 = inlined_call_operand.vmem [shape: bf16[64,64], index: 7, kind: input, shape index: {}]   ;;  %s1830_s8 = inlined_call_operand.vmem [shape: bf16[4,4,16], index: 8, kind: input, shape index: {}]   ;;  %s1831_s9 = inlined_call_operand.hbm [shape: f32[2,16,16], index: 9, kind: output, shape index: {}]  }
   0x1   :  { %v14_v0 = vstv %s1826_s4 }
   0x2   :  { %15 = vst [vmem:[#allocation2] sm:$0x1] %v14_v0 }
   0x3   :  { %16 = vsyncpa [#allocation4], 0 }
   0x4   :  { %18 = vsyncpa [#allocation4 + $0x1], 0  ;;  %s1596_s11 = smov 0   ;;  %s1598_s12 = smov 0  }
   0x5   :  { %s1600_s13 = smov 0   ;;  %s1602_s14 = smov 0  }
   0x6 LB: > { %s1617_s4 = sadd.s32 4294967295, %s1535_s14   ;;  %s1205_s15 = sadd.s32 4294967294, %s1535_s14   ;;  %s1535_s14 = sphi %s1602_s14, %s1837_s14   ;;  %s1531_s13 = sphi %s1600_s13, %s1836_s13   ;;  %s1527_s12 = sphi %s1598_s12, %s1835_s12   ;;  %s1523_s11 = sphi %s1596_s11, %s1834_s11  }
   0x7   : > { %s1621_s16 = sadd.s32 1, %s1535_s14   ;;  %s235_s17 = sadd.s32 1, %s1531_s13 }
   0x8   : > { %s232_s18 = ssub.s32 %s1535_s14, %s1621_s16  ;;  %p245_p0 = scmp.ne.s32.totalorder %s1531_s13, %s1527_s12 }
   0x9   : > { %p233_p1 = scmp.eq.s32.totalorder %s232_s18, 0  ;;  %p246_p2 = scmp.eq.s32.totalorder %s1617_s4, 1 }
   0xa   : > { %p251_p3 = scmp.ne.s32.totalorder %s1527_s12, %s1523_s11  ;;  %p252_p4 = scmp.eq.s32.totalorder %s1205_s15, 1 }
   0xb   : > { %s1632_s19 = scalar_select %p233_p1, %s1531_s13, %s235_s17  }
   0xc   : > { %p1634_p5 = por %p246_p2, %p245_p0  ;;  %p1638_p6 = por %p252_p4, %p251_p3 }
   0xd   : > { %p1208_p7 = scmp.ge.s32.totalorder %s1535_s14, 1  ;;  %p312_p8 = scmp.lt.s32.totalorder %s1535_s14, 3 }
   0xf   : > { %p313_p9 = pnand %p1208_p7, %p312_p8 }
  0x10   : > { %p358_p10 = scmp.lt.s32.totalorder (!%p313_p9), %s1617_s4, 1  ;;  %v1537_v1 = vmov (!%p313_p9), 0.0   ;;  %vm1538_vm0 = vmmov (!%p313_p9), 0   ;;  %v1539_v5 = vmov (!%p313_p9), 0   ;;  %v1216_v16 = vld [vmem:[#allocation2] ss:$0 sm:$0xff] (!%p313_p9) }
  0x11   : > { %316 = sbr.rel (%p313_p9) target bundleno = 596 (0x254), region = 56  ;;  %1295 = vmatprep.subr.bf16.mxu1 (!%p313_p9), %v1537_v1  ;;  %1303 = vmatprep.mubr.msk.bf16.mxu1 (!%p313_p9), %vm1538_vm0, %v1537_v1  ;;  %v1464_v21 = vld [vmem:[%s1825_s3] sm:$0xff] (!%p313_p9)   ;;  %vm403_vm1 = vcmask (!%p313_p9), 523264   ;;  %v1466_v35 = vld [vmem:[%s1827_s5 + $0x8] sm:$0xff] (!%p313_p9)   ;;  %v1467_v36 = vld [vmem:[%s1827_s5 + $0x10] sm:$0xff] (!%p313_p9)   ;;  %vm574_vm2 = vcmask (!%p313_p9), 1043456  }
  0x12   : > { %1323 = vmatprep.subr.bf16.mxu0 (!%p313_p9), %v1537_v1  ;;  %1325 = vmatprep.mubr.msk.bf16.mxu0 (!%p313_p9), %vm1538_vm0, %v1537_v1  ;;  %v1465_v22 = vld [vmem:[%s1827_s5] sm:$0xff] (!%p313_p9)   ;;  %v1468_v43 = vld [vmem:[%s1827_s5 + $0x18] sm:$0xff] (!%p313_p9)   ;;  %v1470_v46 = vld [vmem:[%s1829_s7 + $0x8] sm:$0xff] (!%p313_p9)   ;;  %vm570_vm3 = vcmask (!%p313_p9), 64512   ;;  %vm900_vm4 = vcmask (!%p313_p9), 1041408   ;;  %vm896_vm5 = vcmask (!%p313_p9), 31744  }
  0x13   : > { %1463 = vset.pattern.permute.xlu0 (!%p313_p9), %v1539_v5  ;;  %v1469_v44 = vld [vmem:[%s1829_s7] sm:$0xff] (!%p313_p9)   ;;  %v1471_v47 = vld [vmem:[%s1829_s7 + $0x10] sm:$0xff] (!%p313_p9)   ;;  %v1472_v48 = vld [vmem:[%s1829_s7 + $0x18] sm:$0xff] (!%p313_p9)   ;;  %s1257_s15 = sshll.u32 (!%p313_p9), %s1617_s4, 8  ;;  %vm1102_vm6 = vcmask (!%p313_p9), 130048   ;;  %s1540_s25 = smov (!%p313_p9), [#allocation3]  }
  0x14   : > { %395 = vperm.xlu0 (!%p313_p9), %1463, %v1216_v16   ;;  %v569_v49 = vld [vmem:[%s1828_s6] sm:$0xf] (!%p313_p9)  ;;  %v1228_v57 = vld [vmem:[%s1828_s6 + $0x4] sm:$0xf] (!%p313_p9) }
  0x15   : > { %v576_v50 = vsel (!%p313_p9), %vm574_vm2, %v569_v49, 0  ;;  %v627_v62 = vsel (!%p313_p9), %vm574_vm2, %v1228_v57, 0 }
  0x16   : > { %1324 = vmatpush3.bf16.msra.mxu0 (!%p313_p9), %v576_v50 }
  0x17   : > { %1329 = vmatprep.subr.bf16.mxu0 (!%p313_p9), %v1537_v1 }
  0x18   : > { %s359_s22 = scalar_select %p358_p10, %s1617_s4, 1 }
  0x1a   : > { %s1652_s23 = sshll.u32 %s359_s22, 6  ;;  %s1779_s22 = scalar_lea.hbm %s1831_s9, %s1257_s15 }
  0x1b   : > { %s362_s26 = scalar_lea.vmem %s1822_s0, %s1652_s23  ;;  %s367_s29 = scalar_lea.vmem %s1823_s1, %s1652_s23 }
  0x1c   : > { %v376_v2 = vld [vmem:[%s362_s26] sm:$0xff]  ;;  %v377_v3 = vld [vmem:[%s362_s26 + $0x8] sm:$0xff]  ;;  %v378_v4 = vld [vmem:[%s362_s26 + $0x10] sm:$0xff]  ;;  %s372_s24 = scalar_lea.vmem %s1824_s2, %s1652_s23  ;;  %s355_s23 = sand.u32 1, %s1527_s12  }
  0x1d   : > { %v384_v6 = vpack.c.bf16 %v377_v3, %v376_v2  ;;  %v379_v7 = vld [vmem:[%s362_s26 + $0x18] sm:$0xff]  ;;  %v380_v9 = vld [vmem:[%s362_s26 + $0x20] sm:$0xff]  ;;  %v381_v10 = vld [vmem:[%s362_s26 + $0x28] sm:$0xff] }
  0x1e   : > { %v385_v8 = vpack.c.bf16 %v379_v7, %v378_v4  ;;  %v386_v11 = vpack.c.bf16 %v381_v10, %v380_v9  ;;  %v382_v12 = vld [vmem:[%s362_s26 + $0x30] sm:$0xff]  ;;  %v383_v13 = vld [vmem:[%s362_s26 + $0x38] sm:$0xff]  ;;  %v448_v14 = vld [vmem:[%s367_s29] sm:$0xff]  ;;  %s1477_s26 = sshll.u32 %s1540_s25, 4  ;;  %s1478_s26 = int_to_ptr.vmem [resolvable:$false] %s1477_s26 }
  0x1f   : > { %1296 = vmatpush3.bf16.msra.mxu1 %v384_v6  ;;  %v449_v15 = vld [vmem:[%s367_s29 + $0x8] sm:$0xff]  ;;  %v387_v17 = vpack.c.bf16 %v383_v13, %v382_v12  ;;  %v450_v19 = vld [vmem:[%s367_s29 + $0x10] sm:$0xff]  ;;  %v451_v20 = vld [vmem:[%s367_s29 + $0x18] sm:$0xff]  ;;  %s1479_s27 = scalar_lea.vmem %s1478_s26, 512 }
  0x20   : > { %1297 = vmatprep.subr.bf16.mxu1 %v1537_v1  ;;  %v456_v18 = vpack.c.bf16 %v449_v15, %v448_v14  ;;  %v457_v23 = vpack.c.bf16 %v451_v20, %v450_v19  ;;  %v452_v24 = vld [vmem:[%s367_s29 + $0x20] sm:$0xff]  ;;  %v453_v25 = vld [vmem:[%s367_s29 + $0x28] sm:$0xff]  ;;  %v454_v27 = vld [vmem:[%s367_s29 + $0x30] sm:$0xff] }
  0x21   : > { %v458_v26 = vpack.c.bf16 %v453_v25, %v452_v24  ;;  %v455_v28 = vld [vmem:[%s367_s29 + $0x38] sm:$0xff]  ;;  %v774_v30 = vld [vmem:[%s372_s24] sm:$0xff]  ;;  %v775_v31 = vld [vmem:[%s372_s24 + $0x8] sm:$0xff]  ;;  %s1209_s29 = sshll.u32 %s355_s23, 4 }
  0x22   : > { %v459_v29 = vpack.c.bf16 %v455_v28, %v454_v27  ;;  %v782_v32 = vpack.c.bf16 %v775_v31, %v774_v30  ;;  %v776_v33 = vld [vmem:[%s372_s24 + $0x10] sm:$0xff]  ;;  %v777_v34 = vld [vmem:[%s372_s24 + $0x18] sm:$0xff]  ;;  %v778_v38 = vld [vmem:[%s372_s24 + $0x20] sm:$0xff]  ;;  %s357_s30 = scalar_lea.vmem [#allocation3], %s1209_s29 }
  0x23   : > { %1298 = vmatpush3.bf16.msra.mxu1 %v385_v8  ;;  %v783_v37 = vpack.c.bf16 %v777_v34, %v776_v33  ;;  %v779_v39 = vld [vmem:[%s372_s24 + $0x28] sm:$0xff]  ;;  %v780_v41 = vld [vmem:[%s372_s24 + $0x30] sm:$0xff]  ;;  %v781_v42 = vld [vmem:[%s372_s24 + $0x38] sm:$0xff]  ;;  %s1119_s10 = sshll.u32 %s357_s30, 4  ;;  %s1781_s24 = scalar_lea.sflag [#allocation4], %s355_s23  ;;  %s1774_s10 = int_to_ptr.vmem [resolvable:$true] %s1119_s10 }
  0x24   : > { %1299 = vmatprep.subr.bf16.mxu1 %v1537_v1  ;;  %v784_v40 = vpack.c.bf16 %v779_v39, %v778_v38  ;;  %v785_v45 = vpack.c.bf16 %v781_v42, %v780_v41  ;;  %v1230_v6 = vld [vmem:[%s1828_s6 + $0x8] sm:$0xf]  ;;  %v1232_v15 = vld [vmem:[%s1828_s6 + $0xc] sm:$0xf]  ;;  %v1243_v24 = vld [vmem:[%s1830_s8 + $0x2] sm:$0x3]  ;;  %p1480_p0 = scmp.lt.s32.totalorder %s1774_s10, %s1478_s26 }
  0x25   : > { %v678_v7 = vsel %vm574_vm2, %v1230_v6, 0  ;;  %v729_v20 = vsel %vm574_vm2, %v1232_v15, 0  ;;  %v953_v25 = vsel %vm900_vm4, %v1243_v24, 0  ;;  %v1247_v28 = vld [vmem:[%s1830_s8 + $0x6] sm:$0x3]  ;;  %s1473_s4 = scalar_lea.vmem %s1774_s10, 256 }
  0x26   : > { %p1474_p11 = scmp.ne.s32.totalorder %s1774_s10, %s1473_s4  ;;  %p1481_p1 = scmp.lt.s32.totalorder %s1479_s27, %s1473_s4 }
  0x27   : > { %1300 = vmatpush3.bf16.msra.mxu1 %v386_v11 }
  0x28   : > { %1301 = vmatprep.subr.bf16.mxu1 %v1537_v1  ;;  %p1475_p12 = pnand %p1474_p11, %p1634_p5  ;;  %p1482_p2 = por %p1481_p1, %p1480_p0 }
  0x2a   : > { %p1476_p13 = pneg %p1475_p12 }
  0x2b   : > { %1302 = vmatpush3.bf16.msra.mxu1 %v387_v17 }
  0x2c   : > { %1307 = vmatprep.subr.bf16.mxu1 %v456_v18  ;;  %p1483_p3 = pnand %p1482_p2, %p1476_p13 }
  0x2e   : > { %1304 = vmatmul.mubr.msk.bf16.vlgmr.msra.gmra.mrb[0].mxu1 %vm403_vm1, %v1464_v21 }
  0x2f   : > { %1308 = vmatpush3.bf16.msra.mxu1 %v456_v18  ;;  %1315 = vmatprep.mubr.msk.bf16.mxu1 %vm403_vm1, %v1465_v22  ;;  %v895_v22 = vld [vmem:[%s1830_s8] sm:$0x3] }
  0x30   : > { %1309 = vmatprep.subr.bf16.mxu1 %v457_v23 }
  0x33   : > { %1310 = vmatpush3.bf16.msra.mxu1 %v457_v23  ;;  %v902_v23 = vsel %vm900_vm4, %v895_v22, 0 }
  0x34   : > { %1311 = vmatprep.subr.bf16.mxu1 %v458_v26 }
  0x37   : > { %1312 = vmatpush3.bf16.msra.mxu1 %v458_v26  ;;  %v1245_v26 = vld [vmem:[%s1830_s8 + $0x4] sm:$0x3] }
  0x38   : > { %1313 = vmatprep.subr.bf16.mxu1 %v459_v29  ;;  %v1004_v27 = vsel %vm900_vm4, %v1245_v26, 0 }
  0x3b   : > { %1314 = vmatpush3.bf16.msra.mxu1 %v459_v29  ;;  %v1055_v29 = vsel %vm900_vm4, %v1247_v28, 0 }
  0x3c   : > { %1347 = vmatprep.subr.bf16.mxu1 %v782_v32 }
  0x3e   : > { %1316 = vmatmul.mubr.msk.bf16.vlgmr.msra.gmra.mrb[4].mxu1 %vm403_vm1, %v1466_v35 }
  0x3f   : > { %1319 = vmatprep.mubr.msk.bf16.mxu1 %vm403_vm1, %v1467_v36  ;;  %1348 = vmatpush3.bf16.msra.mxu1 %v782_v32 }
  0x40   : > { %1349 = vmatprep.subr.bf16.mxu1 %v783_v37 }
  0x43   : > { %1350 = vmatpush3.bf16.msra.mxu1 %v783_v37 }
  0x44   : > { %1351 = vmatprep.subr.bf16.mxu1 %v784_v40 }
  0x46   : > { %1320 = vmatmul.mubr.msk.bf16.gmra.mrb[8].mxu1 %vm403_vm1, %v1468_v43 }
  0x47   : > { %1352 = vmatpush3.bf16.msra.mxu1 %v784_v40  ;;  %1355 = vmatprep.mubr.msk.bf16.mxu1 %vm403_vm1, %v1469_v44 }
  0x48   : > { %1353 = vmatprep.subr.bf16.mxu1 %v785_v45 }
  0x4b   : > { %1354 = vmatpush3.bf16.msra.mxu1 %v785_v45 }
  0x4e   : > { %1356 = vmatmul.mubr.msk.bf16.vlgmr.msra.gmra.mrb[12].mxu1 %vm403_vm1, %v1470_v46 }
  0x4f   : > { %1359 = vmatprep.mubr.msk.bf16.mxu1 %vm403_vm1, %v1471_v47 }
  0x56   : > { %1360 = vmatmul.mubr.msk.bf16.gmra.mrb[16].mxu1 %vm403_vm1, %v1472_v48 }
  0x93   : > { %v396_v30 = vpop.permute.xlu0 %395 }
 0x101   : > { %v1710_v51 = vpop.f32.mrb[0].mxu1 }
 0x102   : > { %v1305_v52 = vpop.f32.mrb[1].mxu1  ;;  %v442_v31 = vadd.f32 %v1710_v51, %v396_v30 }
 0x103   : > { %v1712_v53 = vpop.f32.mrb[2].mxu1 }
 0x104   : > { %v1306_v54 = vpop.f32.mrb[3].mxu1  ;;  %v445_v33 = vadd.f32 %v1712_v53, %v396_v30 }
 0x111   : > { %v1317_v55 = vpop.f32.mrb[4].mxu1 }
 0x112   : > { %v534_v56 = vpop.f32.mrb[5].mxu1 }
 0x113   : > { %v1318_v58 = vpop.f32.mrb[6].mxu1 }
 0x114   : > { %v566_v59 = vpack.c.bf16 %v1318_v58, %v1317_v55  ;;  %v537_v60 = vpop.f32.mrb[7].mxu1 }
 0x115   : > { %v565_v61 = vpack.c.bf16 %v537_v60, %v534_v56 }
 0x117   : > { %1326 = vmatmul.mubr.msk.bf16.vlgmr.msra.gmra.mrb[0].mxu0 %vm570_vm3, %v565_v61 }
 0x118   : > { %1330 = vmatpush3.bf16.msra.mxu0 %v627_v62  ;;  %1331 = vmatprep.mubr.msk.bf16.mxu0 %vm1538_vm0, %v1537_v1 }
 0x119   : > { %1335 = vmatprep.subr.bf16.mxu0 %v1537_v1  ;;  %v1321_v63 = vpop.f32.mrb[8].mxu1 }
 0x11a   : > { %v550_v0 = vpop.f32.mrb[9].mxu1 }
 0x11b   : > { %v1322_v2 = vpop.f32.mrb[10].mxu1 }
 0x11c   : > { %v568_v3 = vpack.c.bf16 %v1322_v2, %v1321_v63  ;;  %v553_v4 = vpop.f32.mrb[11].mxu1 }
 0x11d   : > { %v567_v5 = vpack.c.bf16 %v553_v4, %v550_v0 }
 0x121   : > { %v1357_v8 = vpop.f32.mrb[12].mxu1 }
 0x122   : > { %v860_v9 = vpop.f32.mrb[13].mxu1 }
 0x123   : > { %1332 = vmatmul.mubr.msk.bf16.vlgmr.msra.gmra.mrb[0].mxu0 %vm570_vm3, %v566_v59  ;;  %v1358_v10 = vpop.f32.mrb[14].mxu1 }
 0x124   : > { %1336 = vmatpush3.bf16.msra.mxu0 %v678_v7  ;;  %1337 = vmatprep.mubr.msk.bf16.mxu0 %vm1538_vm0, %v1537_v1  ;;  %v892_v11 = vpack.c.bf16 %v1358_v10, %v1357_v8  ;;  %v863_v12 = vpop.f32.mrb[15].mxu1 }
 0x125   : > { %1341 = vmatprep.subr.bf16.mxu0 %v1537_v1  ;;  %v891_v13 = vpack.c.bf16 %v863_v12, %v860_v9 }
 0x129   : > { %v1361_v14 = vpop.f32.mrb[16].mxu1 }
 0x12a   : > { %v876_v16 = vpop.f32.mrb[17].mxu1 }
 0x12b   : > { %v1362_v17 = vpop.f32.mrb[18].mxu1 }
 0x12c   : > { %v894_v18 = vpack.c.bf16 %v1362_v17, %v1361_v14  ;;  %v879_v19 = vpop.f32.mrb[19].mxu1 }
 0x12d   : > { %v893_v21 = vpack.c.bf16 %v879_v19, %v876_v16 }
 0x12f   : > { %1338 = vmatmul.mubr.msk.bf16.vlgmr.msra.gmra.mrb[0].mxu0 %vm570_vm3, %v567_v5 }
 0x130   : > { %1342 = vmatpush3.bf16.msra.mxu0 %v729_v20  ;;  %1343 = vmatprep.mubr.msk.bf16.mxu0 %vm1538_vm0, %v1537_v1 }
 0x131   : > { %1363 = vmatprep.subr.bf16.mxu0 %v1537_v1 }
 0x13b   : > { %1344 = vmatmul.mubr.msk.bf16.vlgmr.msra.gmra.mrb[0].mxu0 %vm570_vm3, %v568_v3 }
 0x13c   : > { %1364 = vmatpush3.bf16.msra.mxu0 %v902_v23  ;;  %1365 = vmatprep.mubr.msk.bf16.mxu0 %vm1538_vm0, %v1537_v1 }
 0x13d   : > { %1369 = vmatprep.subr.bf16.mxu0 %v1537_v1 }
 0x147   : > { %1366 = vmatmul.mubr.msk.bf16.vlgmr.msra.gmra.mrb[0].mxu0 %vm896_vm5, %v891_v13 }
 0x148   : > { %1370 = vmatpush3.bf16.msra.mxu0 %v953_v25  ;;  %1371 = vmatprep.mubr.msk.bf16.mxu0 %vm1538_vm0, %v1537_v1 }
 0x149   : > { %1375 = vmatprep.subr.bf16.mxu0 %v1537_v1 }
 0x153   : > { %1372 = vmatmul.mubr.msk.bf16.vlgmr.msra.gmra.mrb[0].mxu0 %vm896_vm5, %v892_v11 }
 0x154   : > { %1376 = vmatpush3.bf16.msra.mxu0 %v1004_v27  ;;  %1377 = vmatprep.mubr.msk.bf16.mxu0 %vm1538_vm0, %v1537_v1 }
 0x155   : > { %1381 = vmatprep.subr.bf16.mxu0 %v1537_v1 }
 0x15f   : > { %1378 = vmatmul.mubr.msk.bf16.vlgmr.msra.gmra.mrb[0].mxu0 %vm896_vm5, %v893_v21 }
 0x160   : > { %1382 = vmatpush3.bf16.msra.mxu0 %v1055_v29  ;;  %1383 = vmatprep.mubr.msk.bf16.mxu0 %vm1538_vm0, %v1537_v1 }
 0x16b   : > { %1384 = vmatmul.mubr.msk.bf16.vlgmr.msra.gmra.mrb[0].mxu0 %vm896_vm5, %v894_v18 }
 0x23e   : > { %v1091_v32 = vpop.f32.mrb[0].mxu0 }
 0x23f   : > { %v1388_v34 = vadd.f32 %v1091_v32, %v442_v31  ;;  %v1385_v35 = vpop.f32.mrb[1].mxu0 }
 0x240   : > { %v1094_v36 = vpop.f32.mrb[2].mxu0 }
 0x241   : > { %v1100_v37 = vmax.f32 %v1388_v34, 0.0  ;;  %v1390_v1 = vadd.f32 %v1094_v36, %v445_v33  ;;  %v1386_v38 = vpop.f32.mrb[3].mxu0 }
 0x243   : > { %1103 = vst.msk [vmem:[%s357_s30] sm:$0xff] %vm1102_vm6, %v1100_v37  ;;  %v1101_v39 = vmax.f32 %v1390_v1, 0.0 }
 0x245   : > { %1104 = vst.msk [vmem:[%s357_s30 + $0x8] sm:$0xff] %vm1102_vm6, %v1101_v39 }
 0x246   : > { %1486 = shalt.err (!%p1483_p3)
}
 0x247   : > { %s1487_s28 = scalar_lea.hbm %s1779_s22, 256  ;;  %s1491_s30 = scalar_lea.hbm %s1831_s9, 512 }
 0x248   : > { %p1488_p4 = scmp.ne.s32.totalorder %s1779_s22, %s1487_s28  ;;  %p1492_p9 = scmp.lt.u32.totalorder %s1779_s22, %s1831_s9 }
 0x249   : > { %p1493_p10 = scmp.lt.u32.totalorder %s1491_s30, %s1487_s28  ;;  %p1495_p12 = scmp.lt.u32.totalorder %s1487_s28, %s1779_s22 }
 0x24a   : > { %p1489_p7 = pnand %p1488_p4, %p1634_p5 }
 0x24b   : > { %p1494_p11 = por %p1493_p10, %p1492_p9 }
 0x24c   : > { %p1490_p8 = pneg %p1489_p7 }
 0x24d   : > { %p1496_p13 = por %p1495_p12, %p1494_p11 }
 0x24f   : > { %p1497_p0 = pnand %p1496_p13, %p1490_p8 }
 0x251   : > { %1500 = shalt.err (!%p1497_p0)
}
 0x252   : > { %s1541_s18 = smov 128   ;;  %s1542_s4 = smov 8  }
 0x253   : > { %1419 = dma.vmem_to_hbm [thread:$0]  (%p1634_p5), %s1774_s10, 256, %s1779_s22, %s1781_s24, %s1541_s18, %s1541_s18, %s1542_s4  }
 0x254 PF: > { %p1425_p1 = scmp.ge.s32.totalorder %s1535_s14, 2  ;;  %s1134_s25 = sand.u32 1, %s1523_s11  }
 0x255   : > { %s1135_s26 = scalar_lea.sflag [#allocation4], %s1134_s25 }
 0x256   : > { %p1422_p2 = pnand %p1425_p1, %p1638_p6 }
 0x258   : > { %1518 = dma.done.wait (!%p1422_p2), %s1135_s26, 256  }
 0x259   : > { %1520 = vsyncadd (!%p1422_p2), %s1135_s26, 4294967040  ;;  %p21_p3 = scmp.ge.s32.totalorder %s1621_s16, 4   ;;  %s1834_s11 = smov %s1527_s12 }
 0x25a   : > { %s1835_s12 = smov %s1531_s13  ;;  %s1836_s13 = smov %s1632_s19 }
 0x25b   : > { %s1837_s14 = smov %s1621_s16  ;;  %23 = sbr.rel (!%p21_p3) target bundleno = 6 (0x6), region = 103 }
 0x262   :  { %1140 = vsyncpa [#allocation4], 1 }
 0x263   :  { %1142 = vsyncpa [#allocation4 + $0x1], 1 }

</bundles_post_ra>
